<compile_context>
chip_gen: v7x
topology: tpu7x:2x2x1
jax: 0.10.0
libtpu: 0.0.40
codegen_flags: <defaults>
</compile_context>

<pallas_src>
import jax
import jax.numpy as jnp
from jax.experimental import pallas as pl
from jax.experimental.pallas import tpu as pltpu

_LANES = 128
_SUBLANES = 8
_MAX_BLOCK_ROWS = 2048   # 2048 x 128 f32 = 1 MiB per input tile
_NUM_SPLITS = 2          # leading "parallel" axis (v7x megacore; no-op on 1-TC chips)


def _tversky_partials_kernel(x_ref, t_ref, acc_ref):
    """Accumulate vreg-shaped partial sums for one split.

    acc_ref is this split's (24, 128) output block, resident in VMEM across
    the inner ("arbitrary") grid axis:
        rows  0.. 7 : partial sum of p = sigmoid(x)
        rows  8..15 : partial sum of t
        rows 16..23 : partial sum of p * t
    """
    i = pl.program_id(1)

    @pl.when(i == 0)
    def _():
        acc_ref[...] = jnp.zeros_like(acc_ref)

    p = jax.nn.sigmoid(x_ref[...].astype(jnp.float32))
    t = t_ref[...].astype(jnp.float32)

    # Keep the reduction vreg-shaped: fold the tile to (k, 8, 128) and add the
    # leading axis on the VPU. The cross-lane/cross-sublane reduction to a
    # scalar happens exactly once, outside the kernel.
    p3 = p.reshape(-1, _SUBLANES, _LANES)
    t3 = t.reshape(-1, _SUBLANES, _LANES)

    acc_ref[0 * _SUBLANES:1 * _SUBLANES, :] += jnp.sum(p3, axis=0)
    acc_ref[1 * _SUBLANES:2 * _SUBLANES, :] += jnp.sum(t3, axis=0)
    acc_ref[2 * _SUBLANES:3 * _SUBLANES, :] += jnp.sum(p3 * t3, axis=0)


def tversky_loss(inputs, targets, smooth=1.0, alpha=0.7, gamma=3.0 / 4.0):
    """Matches Tversky.forward(inputs, targets, smooth, alpha, gamma)."""
    x = jnp.ravel(inputs)
    t = jnp.ravel(targets)
    n = x.shape[0]

    total_rows = pl.cdiv(n, _LANES)
    rows_per_split = pl.cdiv(total_rows, _NUM_SPLITS)
    block_rows = min(
        _MAX_BLOCK_ROWS,
        max(_SUBLANES, pl.cdiv(rows_per_split, _SUBLANES) * _SUBLANES))
    chunks_per_split = pl.cdiv(rows_per_split, block_rows)
    rows = _NUM_SPLITS * chunks_per_split * block_rows
    padded = rows * _LANES
    pad_count = padded - n

    # Inputs stay in their native dtype (cast to f32 inside the kernel). Only
    # pad when the flat size does not already tile evenly; padded logits are 0
    # -> sigmoid == 0.5 exactly, padded targets are 0, so the only spurious
    # contribution is 0.5 * pad_count added to sum(p), subtracted below.
    # TODO(synk): mask the ragged tail in-kernel to avoid the full-array pad copy.
    if pad_count:
        x = jnp.pad(x, (0, pad_count))
        t = jnp.pad(t, (0, pad_count))
    x2 = x.reshape(rows, _LANES)
    t2 = t.reshape(rows, _LANES)

    in_map = lambda c, i: (c * chunks_per_split + i, 0)

    partials = pl.pallas_call(
        _tversky_partials_kernel,
        out_shape=jax.ShapeDtypeStruct(
            (_NUM_SPLITS * 3 * _SUBLANES, _LANES), jnp.float32),
        grid_spec=pltpu.PrefetchScalarGridSpec(
            num_scalar_prefetch=0,
            grid=(_NUM_SPLITS, chunks_per_split),
            in_specs=[
                pl.BlockSpec((block_rows, _LANES), in_map),
                pl.BlockSpec((block_rows, _LANES), in_map),
            ],
            out_specs=pl.BlockSpec((3 * _SUBLANES, _LANES),
                                   lambda c, i: (c, 0)),
        ),
        compiler_params=pltpu.CompilerParams(
            dimension_semantics=("parallel", "arbitrary")),
    )(x2, t2)

    # Tiny epilogue in JAX: reduce the vreg-shaped partials to three scalars
    # and apply the Tversky combine (a handful of flops, negligible).
    sums = jnp.sum(partials.reshape(_NUM_SPLITS, 3, _SUBLANES, _LANES),
                   axis=(0, 2, 3))
    sum_p = sums[0] - 0.5 * pad_count   # remove exact contribution of padding
    sum_t = sums[1]
    tp = sums[2]
    fn = sum_t - tp                     # == sum(t * (1 - p))
    fp = sum_p - tp                     # == sum((1 - t) * p)
    tv = (tp + smooth) / (tp + alpha * fn + (1.0 - alpha) * fp + smooth)
    base = jnp.maximum(1.0 - tv, 0.0)   # guard fractional pow against tiny negatives
    if gamma is None:
        return base
    return jnp.power(base, jnp.float32(gamma))


def _tversky_ref(inputs, targets, smooth=1.0, alpha=0.7, gamma=3.0 / 4.0):
    p = jax.nn.sigmoid(inputs.astype(jnp.float32)).ravel()
    t = targets.astype(jnp.float32).ravel()
    tp = jnp.sum(p * t)
    fn = jnp.sum(t * (1.0 - p))
    fp = jnp.sum((1.0 - t) * p)
    tv = (tp + smooth) / (tp + alpha * fn + (1.0 - alpha) * fp + smooth)
    return (1.0 - tv) if gamma is None else jnp.power(1.0 - tv, gamma)


if __name__ == "__main__":
    key = jax.random.PRNGKey(0)
    k1, k2 = jax.random.split(key)
    # NCHW like the PyTorch module: logits + binary mask targets.
    x = jax.random.normal(k1, (2, 4, 16, 16), dtype=jnp.float32)
    y = (jax.random.uniform(k2, (2, 4, 16, 16)) > 0.5).astype(jnp.float32)

    loss = jax.block_until_ready(tversky_loss(x, y))
    ref = jax.block_until_ready(_tversky_ref(x, y))
    assert jnp.allclose(loss, ref, rtol=1e-5, atol=1e-5), (loss, ref)
    print("KERNEL_OK")
</pallas_src>

<mosaic_0001>
module attributes {stable_mosaic.version = 11 : i64} {
  func.func @_tversky_partials_kernel(%arg0: i32, %arg1: i32, %arg2: memref<8x128xf32, #tpu.memory_space<vmem>>, %arg3: memref<8x128xf32, #tpu.memory_space<vmem>>, %arg4: memref<24x128xf32, #tpu.memory_space<vmem>>) attributes {dimension_semantics = [#tpu.dimension_semantics<parallel>, #tpu.dimension_semantics<arbitrary>], iteration_bounds = array<i64: 2, 1>, scalar_prefetch = 0 : i64, scratch_operands = 0 : i64, tpu.core_type = #tpu.core_type<tc>, window_params = [{transform_indices = @transform_0, window_bounds = array<i64: 8, 128>}, {transform_indices = @transform_1, window_bounds = array<i64: 8, 128>}, {transform_indices = @transform_2, window_bounds = array<i64: 24, 128>}]} {
    %c0_i32 = arith.constant 0 : i32
    %0 = arith.cmpi eq, %arg1, %c0_i32 : i32
    %1 = arith.extui %0 : i1 to i32
    %c0_i32_0 = arith.constant 0 : i32
    %2 = arith.cmpi ne, %1, %c0_i32_0 : i32
    scf.if %2 {
      %cst_17 = arith.constant 0.000000e+00 : f32
      %25 = vector.broadcast %cst_17 : f32 to vector<24x128xf32>
      %c0_18 = arith.constant 0 : index
      %c0_19 = arith.constant 0 : index
      %26 = vector.load %arg4[%c0_18, %c0_19] : memref<24x128xf32, #tpu.memory_space<vmem>>, vector<24x128xf32>
      tpu.vector_store %arg4[%c0_18, %c0_19], %25 {strides = array<i32>} : memref<24x128xf32, #tpu.memory_space<vmem>>, vector<24x128xf32>,
    } else {
    }
    %c0 = arith.constant 0 : index
    %c0_1 = arith.constant 0 : index
    %3 = vector.load %arg2[%c0, %c0_1] : memref<8x128xf32, #tpu.memory_space<vmem>>, vector<8x128xf32>
    %4 = arith.negf %3 : vector<8x128xf32>
    %5 = math.exp %4 : vector<8x128xf32>
    %cst = arith.constant 1.000000e+00 : f32
    %6 = vector.broadcast %cst : f32 to vector<8x128xf32>
    %7 = arith.addf %6, %5 : vector<8x128xf32>
    %8 = arith.divf %6, %7 : vector<8x128xf32>
    %c0_2 = arith.constant 0 : index
    %c0_3 = arith.constant 0 : index
    %9 = vector.load %arg3[%c0_2, %c0_3] : memref<8x128xf32, #tpu.memory_space<vmem>>, vector<8x128xf32>
    %10 = vector.shape_cast %8 : vector<8x128xf32> to vector<1x8x128xf32>
    %11 = vector.shape_cast %9 : vector<8x128xf32> to vector<1x8x128xf32>
    %c0_4 = arith.constant 0 : index
    %c0_5 = arith.constant 0 : index
    %12 = vector.load %arg4[%c0_4, %c0_5] : memref<24x128xf32, #tpu.memory_space<vmem>>, vector<8x128xf32>
    %cst_6 = arith.constant dense<0.000000e+00> : vector<8x128xf32>
    %13 = vector.multi_reduction <add>, %10, %cst_6 [0] : vector<1x8x128xf32> to vector<8x128xf32>
    %14 = arith.addf %12, %13 : vector<8x128xf32>
    %c0_7 = arith.constant 0 : index
    %c0_8 = arith.constant 0 : index
    %15 = vector.load %arg4[%c0_7, %c0_8] : memref<24x128xf32, #tpu.memory_space<vmem>>, vector<8x128xf32>
    tpu.vector_store %arg4[%c0_7, %c0_8], %14 {strides = array<i32>} : memref<24x128xf32, #tpu.memory_space<vmem>>, vector<8x128xf32>,
    %c8 = arith.constant 8 : index
    %c0_9 = arith.constant 0 : index
    %16 = vector.load %arg4[%c8, %c0_9] : memref<24x128xf32, #tpu.memory_space<vmem>>, vector<8x128xf32>
    %cst_10 = arith.constant dense<0.000000e+00> : vector<8x128xf32>
    %17 = vector.multi_reduction <add>, %11, %cst_10 [0] : vector<1x8x128xf32> to vector<8x128xf32>
    %18 = arith.addf %16, %17 : vector<8x128xf32>
    %c8_11 = arith.constant 8 : index
    %c0_12 = arith.constant 0 : index
    %19 = vector.load %arg4[%c8_11, %c0_12] : memref<24x128xf32, #tpu.memory_space<vmem>>, vector<8x128xf32>
    tpu.vector_store %arg4[%c8_11, %c0_12], %18 {strides = array<i32>} : memref<24x128xf32, #tpu.memory_space<vmem>>, vector<8x128xf32>,
    %c16 = arith.constant 16 : index
    %c0_13 = arith.constant 0 : index
    %20 = vector.load %arg4[%c16, %c0_13] : memref<24x128xf32, #tpu.memory_space<vmem>>, vector<8x128xf32>
    %21 = arith.mulf %10, %11 : vector<1x8x128xf32>
    %cst_14 = arith.constant dense<0.000000e+00> : vector<8x128xf32>
    %22 = vector.multi_reduction <add>, %21, %cst_14 [0] : vector<1x8x128xf32> to vector<8x128xf32>
    %23 = arith.addf %20, %22 : vector<8x128xf32>
    %c16_15 = arith.constant 16 : index
    %c0_16 = arith.constant 0 : index
    %24 = vector.load %arg4[%c16_15, %c0_16] : memref<24x128xf32, #tpu.memory_space<vmem>>, vector<8x128xf32>
    tpu.vector_store %arg4[%c16_15, %c0_16], %23 {strides = array<i32>} : memref<24x128xf32, #tpu.memory_space<vmem>>, vector<8x128xf32>,
    return
  }
  func.func @transform_0(%arg0: i32, %arg1: i32) -> (i32, i32) {
    %c1_i32 = arith.constant 1 : i32
    %0 = arith.muli %arg0, %c1_i32 : i32
    %1 = arith.addi %0, %arg1 : i32
    %c0_i32 = arith.constant 0 : i32
    %c0_i32_0 = arith.constant 0 : i32
    return %1, %c0_i32 : i32, i32
  }
  func.func @transform_1(%arg0: i32, %arg1: i32) -> (i32, i32) {
    %c1_i32 = arith.constant 1 : i32
    %0 = arith.muli %arg0, %c1_i32 : i32
    %1 = arith.addi %0, %arg1 : i32
    %c0_i32 = arith.constant 0 : i32
    %c0_i32_0 = arith.constant 0 : i32
    return %1, %c0_i32 : i32, i32
  }
  func.func @transform_2(%arg0: i32, %arg1: i32) -> (i32, i32) {
    %c0_i32 = arith.constant 0 : i32
    %c0_i32_0 = arith.constant 0 : i32
    return %arg0, %c0_i32 : i32, i32
  }
}

</mosaic_0001>

<bundles_post_ra>
// kernel: tpu_custom_call.1
= control target key start
LH: loop header
LB: loop body
LE: loop exit
PB: predicated region body
PF: predicated region fallthrough
CT: control target
= control target key end

     0   :  { %7 = vsyncpa [#allocation3], 0  ;;  %s847_s0 = inlined_call_operand.hbm [shape: f32[16,128], index: 0, kind: input, shape index: {}]   ;;  %s848_s1 = inlined_call_operand.hbm [shape: f32[16,128], index: 1, kind: input, shape index: {}]   ;;  %s849_s2 = inlined_call_operand.hbm [shape: f32[48,128], index: 2, kind: output, shape index: {}]  }
   0x1   :  { %9 = vsyncpa [#allocation3 + $0x1], 0 }
   0x2   :  { %10 = vsyncpa [#allocation6], 0 }
   0x3   :  { %12 = vsyncpa [#allocation6 + $0x1], 0 }
   0x4   :  { %13 = vsyncpa [#allocation4], 0 }
   0x5   :  { %15 = vsyncpa [#allocation4 + $0x1], 0  ;;  %s624_s9 = smov 0   ;;  %s626_s10 = smov 0  }
   0x6   :  { %s628_s11 = smov 0   ;;  %s630_s12 = smov 0  }
   0x7   :  { %s632_s13 = smov 0   ;;  %s634_s14 = smov 0  }
   0x8 LB: > { %s365_s15 = sadd.s32 4294967295, %s602_s14   ;;  %s366_s16 = sadd.s32 4294967294, %s602_s14   ;;  %s602_s14 = sphi %s634_s14, %s21_s14   ;;  %s598_s13 = sphi %s632_s13, %s869_s13   ;;  %s594_s12 = sphi %s630_s12, %s868_s12   ;;  %s590_s11 = sphi %s628_s11, %s867_s11   ;;  %s586_s10 = sphi %s626_s10, %s866_s10   ;;  %s582_s9 = sphi %s624_s9, %s865_s9  }
   0x9   : > { %s33_s17 = sadd.s32 1, %s598_s13  ;;  %s42_s18 = sadd.s32 1, %s590_s11 }
   0xa   : > { %p35_p0 = scmp.ge.s32.totalorder %s33_s17, 2  ;;  %p49_p1 = scmp.ne.s32.totalorder %s590_s11, %s586_s10 }
   0xb   : > { %p50_p2 = scmp.eq.s32.totalorder %s602_s14, 0  ;;  %p55_p3 = scmp.ne.s32.totalorder %s586_s10, %s582_s9 }
   0xc   : > { %s871_s17 = smov (%p35_p0, %s33_s17), 0  ;;  %p56_p5 = scmp.eq.s32.totalorder %s365_s15, 0 }
   0xd   : > { %p665_p4 = por %p50_p2, %p49_p1  ;;  %s39_s20 = ssub.s32 %s598_s13, %s871_s17 }
   0xe   : > { %p107_p6 = scmp.eq.s32.totalorder %s365_s15, 1  ;;  %p40_p7 = scmp.eq.s32.totalorder %s39_s20, 0 }
   0xf   : > { %p671_p8 = por %p56_p5, %p55_p3  ;;  %p113_p10 = scmp.eq.s32.totalorder %s366_s16, 1 }
  0x10   : > { %p675_p9 = por %p107_p6, %p49_p1  ;;  %p399_p13 = scmp.lt.s32.totalorder %s602_s14, 2 }
  0x11   : > { %s853_s21 = scalar_select %p671_p8, 1, 0 }
  0x12   : > { %s854_s22 = scalar_select %p675_p9, 1, 0 }
  0x13   : > { %s680_s23 = scalar_select %p40_p7, %s590_s11, %s42_s18  }
  0x14   : > { %p682_p11 = por %p113_p10, %p55_p3  ;;  %s689_s25 = sand.u32 1, %s590_s11  }
  0x15   : > { %s369_s26 = sshll.u32 %s689_s25, 3  ;;  %s370_s27 = sshll.u32 %s598_s13, 7 }
  0x16   : > { %s855_s24 = scalar_select %p682_p11, 1, 0 }
  0x17   : > { %s698_s30 = scalar_lea.hbm %s847_s0, %s370_s27  ;;  %s137_s3 = scalar_lea.vmem [#allocation2], %s369_s26 }
  0x18   : > { %s145_s4 = sshll.u32 %s137_s3, 4  ;;  %p706_p0 = pnand %p399_p13, %p665_p4  ;;  %s702_s4 = int_to_ptr.vmem [resolvable:$true] %s145_s4 }
  0x19   : > { %s134_s6 = scalar_lea.sflag [#allocation3], %s689_s25  ;;  %s456_s7 = scalar_lea.hbm %s698_s30, 128 }
  0x1a   : > { %p457_p3 = scmp.ne.s32.totalorder %s698_s30, %s456_s7  ;;  %p458_p5 = pneg %p706_p0 }
  0x1b   : > { %s461_s16 = scalar_lea.hbm %s847_s0, 256  ;;  %p462_p4 = scmp.lt.u32.totalorder %s698_s30, %s847_s0 }
  0x1c   : > { %p459_p6 = pnand %p458_p5, %p457_p3  ;;  %p463_p10 = scmp.lt.u32.totalorder %s461_s16, %s456_s7 }
  0x1d   : > { %p465_p12 = scmp.lt.u32.totalorder %s456_s7, %s698_s30 }
  0x1e   : > { %p460_p7 = pneg %p459_p6  ;;  %p464_p13 = por %p463_p10, %p462_p4 }
  0x20   : > { %p466_p1 = por %p465_p12, %p464_p13 }
  0x22   : > { %p467_p2 = pnand %p466_p1, %p460_p7 }
  0x24   : > { %470 = shalt.err (!%p467_p2)
}
  0x25   : > { %s471_s20 = scalar_lea.vmem %s702_s4, 128  ;;  %s604_s28 = smov [#allocation2]  }
  0x26   : > { %p472_p3 = scmp.ne.s32.totalorder %s702_s4, %s471_s20  ;;  %s476_s29 = sshll.u32 %s604_s28, 4  ;;  %s477_s29 = int_to_ptr.vmem [resolvable:$false] %s476_s29 }
  0x27   : > { %s478_s3 = scalar_lea.vmem %s477_s29, 256  ;;  %p479_p9 = scmp.lt.s32.totalorder %s702_s4, %s477_s29 }
  0x28   : > { %p474_p6 = pnand %p472_p3, %p458_p5  ;;  %p480_p4 = scmp.lt.s32.totalorder %s478_s3, %s471_s20 }
  0x2a   : > { %p475_p11 = pneg %p474_p6  ;;  %p481_p10 = por %p480_p4, %p479_p9 }
  0x2c   : > { %p482_p12 = pnand %p481_p10, %p475_p11 }
  0x2e   : > { %485 = shalt.err (!%p482_p12)
}
  0x2f   : > { %391 = dma.hbm_to_vmem [thread:$0]  (!%p706_p0), %s698_s30, 128, %s702_s4, %s134_s6  }
  0x30   : > { %p857_p1 = scmp.lt.s32.totalorder %s602_s14, 3  ;;  %p858_p2 = scmp.ge.s32.totalorder %s602_s14, 1 }
  0x31   : > { %s751_s16 = scalar_lea.hbm %s848_s1, %s370_s27  ;;  %s156_s18 = scalar_lea.vmem [#allocation5], %s369_s26 }
  0x32   : > { %p742_p7 = pnand %p858_p2, %p857_p1  ;;  %s164_s19 = sshll.u32 %s156_s18, 4  ;;  %s165_s19 = int_to_ptr.vmem [resolvable:$true] %s164_s19 }
  0x33   : > { %s153_s30 = scalar_lea.sflag [#allocation6], %s689_s25  ;;  %s486_s4 = scalar_lea.hbm %s751_s16, 128 }
  0x34   : > { %s859_s7 = scalar_select %p742_p7, 1, 0 }
  0x35   : > { %p487_p9 = scmp.ne.s32.totalorder %s751_s16, %s486_s4  ;;  %s491_s27 = scalar_lea.hbm %s848_s1, 256 }
  0x36   : > { %p492_p3 = scmp.lt.u32.totalorder %s751_s16, %s848_s1  ;;  %p493_p6 = scmp.lt.u32.totalorder %s491_s27, %s486_s4 }
  0x37   : > { %p489_p11 = pnand %p487_p9, %p458_p5  ;;  %p495_p10 = scmp.lt.u32.totalorder %s486_s4, %s751_s16 }
  0x38   : > { %p494_p4 = por %p493_p6, %p492_p3 }
  0x39   : > { %p490_p13 = pneg %p489_p11 }
  0x3a   : > { %p496_p12 = por %p495_p10, %p494_p4 }
  0x3c   : > { %p497_p1 = pnand %p496_p12, %p490_p13 }
  0x3e   : > { %500 = shalt.err (!%p497_p1)
}
  0x3f   : > { %s501_s25 = scalar_lea.vmem %s165_s19, 128  ;;  %s605_s26 = smov [#allocation5]  }
  0x40   : > { %p502_p2 = scmp.ne.s32.totalorder %s165_s19, %s501_s25  ;;  %s506_s3 = sshll.u32 %s605_s26, 4  ;;  %s507_s3 = int_to_ptr.vmem [resolvable:$false] %s506_s3 }
  0x41   : > { %s508_s8 = scalar_lea.vmem %s507_s3, 256  ;;  %p509_p8 = scmp.lt.s32.totalorder %s165_s19, %s507_s3 }
  0x42   : > { %p504_p9 = pnand %p502_p2, %p458_p5  ;;  %p510_p7 = scmp.lt.s32.totalorder %s508_s8, %s501_s25 }
  0x44   : > { %p505_p11 = pneg %p504_p9  ;;  %p511_p3 = por %p510_p7, %p509_p8 }
  0x46   : > { %p512_p6 = pnand %p511_p3, %p505_p11 }
  0x48   : > { %515 = shalt.err (!%p512_p6)
}
  0x49   : > { %394 = dma.hbm_to_vmem [thread:$0]  (!%p706_p0), %s751_s16, 128, %s165_s19, %s153_s30  }
  0x4a   : > { %p860_p13 = scmp.ne.s32.totalorder %s859_s7, 0 }
  0x4b   : > { %s778_s15 = sand.u32 (!%p860_p13), 1, %s586_s10   ;;  %p861_p5 = scmp.ne.s32.totalorder (!%p860_p13), %s853_s21, 0 }
  0x4c   : > { %173 = sbr.rel (%p860_p13) target bundleno = 130 (0x82), region = 28  ;;  %s374_s18 = sshll.u32 (!%p860_p13), %s778_s15, 3 }
  0x4d   : > { %s176_s4 = scalar_lea.sflag (!%p860_p13), [#allocation3], %s778_s15  ;;  %s179_s6 = scalar_lea.vmem (!%p860_p13), [#allocation2], %s374_s18 }
  0x53   : > { %569 = dma.done.wait (%p861_p5), %s176_s4, 128  }
  0x54   : > { %571 = vsyncadd (%p861_p5), %s176_s4, 4294967168  ;;  %s185_s5 = scalar_lea.sflag [#allocation6], %s778_s15  ;;  %s188_s16 = scalar_lea.vmem [#allocation5], %s374_s18 }
  0x55   : > { %573 = dma.done.wait (%p861_p5), %s185_s5, 128  }
  0x56   : > { %575 = vsyncadd (%p861_p5), %s185_s5, 4294967168  ;;  %s381_s7 = smul.u32 24, %s778_s15  ;;  %v224_v0 = vld [vmem:[%s179_s6] sm:$0xff]  ;;  %v231_v1 = vld [vmem:[%s188_s16] sm:$0xff]  ;;  %s246_s29 = scalar_lea.sflag [#allocation4], %s778_s15 }
  0x57   : > { %v376_v2 = vmul.f32 -1.442695, %v224_v0  ;;  %s380_s30 = smul.u32 384, %s594_s12  ;;  %p862_p0 = scmp.ne.s32.totalorder %s854_s22, 0 }
  0x58   : > { %s213_s19 = scalar_lea.vmem [#allocation7], %s381_s7  ;;  %s606_s12 = smov [#allocation7]  }
  0x59   : > { %452 = vpow2.f32 %v376_v2  ;;  %239 = vst [vmem:[%s213_s19 + $0x8] sm:$0xff] %v231_v1  ;;  %s259_s20 = sshll.u32 %s213_s19, 4  ;;  %s796_s28 = scalar_lea.hbm %s849_s2, %s380_s30  ;;  %s798_s20 = int_to_ptr.vmem [resolvable:$true] %s259_s20 }
  0x5a   : > { %s516_s25 = scalar_lea.vmem %s798_s20, 384  ;;  %s520_s26 = sshll.u32 %s606_s12, 4  ;;  %s521_s26 = int_to_ptr.vmem [resolvable:$false] %s520_s26 }
  0x5b   : > { %p517_p8 = scmp.ne.s32.totalorder %s798_s20, %s516_s25  ;;  %s522_s3 = scalar_lea.vmem %s521_s26, 768 }
  0x5c   : > { %p523_p10 = scmp.lt.s32.totalorder %s798_s20, %s521_s26  ;;  %p524_p12 = scmp.lt.s32.totalorder %s522_s3, %s516_s25 }
  0x5d   : > { %p518_p7 = pnand %p517_p8, %p862_p0 }
  0x5e   : > { %p525_p1 = por %p524_p12, %p523_p10 }
  0x5f   : > { %p519_p4 = pneg %p518_p7 }
  0x61   : > { %p526_p2 = pnand %p525_p1, %p519_p4 }
  0x63   : > { %v453_v3 = vpop.eup %452 }
  0x64   : > { %v228_v4 = vadd.f32 1.0, %v453_v3 }
  0x66   : > { %454 = vrcp.f32 %v228_v4 }
  0x70   : > { %v455_v5 = vpop.eup %454 }
  0x71   : > { %v241_v6 = vmul.f32 %v455_v5, %v231_v1  ;;  %235 = vst [vmem:[%s213_s19] sm:$0xff] %v455_v5 }
  0x73   : > { %244 = vst [vmem:[%s213_s19 + $0x10] sm:$0xff] %v241_v6 }
  0x74   : > { %529 = shalt.err (!%p526_p2)
}
  0x75   : > { %s530_s8 = scalar_lea.hbm %s796_s28, 384  ;;  %s534_s6 = scalar_lea.hbm %s849_s2, 768 }
  0x76   : > { %p531_p9 = scmp.ne.s32.totalorder %s796_s28, %s530_s8  ;;  %p535_p6 = scmp.lt.u32.totalorder %s796_s28, %s849_s2 }
  0x77   : > { %p536_p13 = scmp.lt.u32.totalorder %s534_s6, %s530_s8  ;;  %p538_p8 = scmp.lt.u32.totalorder %s530_s8, %s796_s28 }
  0x78   : > { %p532_p11 = pnand %p531_p9, %p862_p0 }
  0x79   : > { %p537_p5 = por %p536_p13, %p535_p6 }
  0x7a   : > { %p533_p3 = pneg %p532_p11 }
  0x7b   : > { %p539_p7 = por %p538_p8, %p537_p5 }
  0x7d   : > { %p540_p4 = pnand %p539_p7, %p533_p3 }
  0x7f   : > { %543 = shalt.err (!%p540_p4)
}
  0x80   : > { %s607_s7 = smov 128   ;;  %s608_s19 = smov 8  }
  0x81   : > { %386 = dma.vmem_to_hbm [thread:$0]  (%p862_p0), %s798_s20, 384, %s796_s28, %s246_s29, %s607_s7, %s607_s7, %s608_s19  }
  0x82 PF: > { %s274_s30 = sand.u32 1, %s582_s9   ;;  %p863_p10 = scmp.ne.s32.totalorder %s855_s24, 0 }
  0x83   : > { %p864_p12 = scmp.ge.s32.totalorder %s602_s14, 2  ;;  %s275_s21 = scalar_lea.sflag [#allocation4], %s274_s30 }
  0x85   : > { %p396_p1 = pnand %p864_p12, %p863_p10 }
  0x87   : > { %577 = dma.done.wait (!%p396_p1), %s275_s21, 384  }
  0x88   : > { %579 = vsyncadd (!%p396_p1), %s275_s21, 4294966912  ;;  %s21_s14 = sadd.s32 1, %s602_s14   ;;  %s865_s9 = smov %s586_s10 }
  0x89   : > { %p18_p2 = scmp.ge.s32.totalorder %s21_s14, 4   ;;  %s866_s10 = smov %s590_s11 }
  0x8a   : > { %s867_s11 = smov %s680_s23  ;;  %s868_s12 = smov %s598_s13 }
  0x8b   : > { %s869_s13 = smov %s871_s17  ;;  %20 = sbr.rel (!%p18_p2) target bundleno = 8 (0x8), region = 90 }
  0x92   :  { %280 = vsyncpa [#allocation3], 1 }
  0x93   :  { %282 = vsyncpa [#allocation3 + $0x1], 1 }
  0x94   :  { %283 = vsyncpa [#allocation6], 1 }
  0x95   :  { %285 = vsyncpa [#allocation6 + $0x1], 1 }
  0x96   :  { %286 = vsyncpa [#allocation4], 1 }
  0x97   :  { %288 = vsyncpa [#allocation4 + $0x1], 1 }

</bundles_post_ra>
